<compile_context>
chip_gen: v7x
topology: tpu7x:2x2x1
jax: 0.10.0
libtpu: 0.0.40
codegen_flags: <defaults>
</compile_context>

<pallas_src>
import functools

import jax
import jax.numpy as jnp
from jax.experimental import pallas as pl
from jax.experimental.pallas import tpu as pltpu


def _round_up(x, m):
    return ((x + m - 1) // m) * m


def _pad_conv2d_kernel(x_ref, w_ref, b_ref, o_ref, acc_ref, *, tap_starts, L):
    # x_ref  : (1, Cp, Lin)      flattened zero-padded input, one batch element
    # w_ref  : (KH*KW, OCp, Cp)  per-tap weights (tap-major, transposed)
    # b_ref  : (OCp, 1)          bias (broadcast along lanes)
    # o_ref  : (1, OCp, L)       flattened output, L multiple of 128
    # acc_ref: (OCp, L) f32      VMEM scratch accumulator
    acc_ref[...] = jnp.zeros_like(acc_ref)
    # KH*KW taps (typically 9) unrolled; each tap is one MXU matmul with a
    # static contiguous lane slice of the input.
    for t, start in enumerate(tap_starts):
        xsl = x_ref[0, :, pl.ds(start, L)]                      # (Cp, L)
        acc_ref[...] += jnp.dot(w_ref[t], xsl,
                                preferred_element_type=jnp.float32)
    o_ref[0] = (acc_ref[...] + b_ref[...].astype(jnp.float32)).astype(o_ref.dtype)


def pad_conv2d(x, weight, bias=None, *, stride=1, dilation=1):
    """PadConv2d forward. x: (N, C, H, W), weight: (OC, C, KH, KW), bias: (OC,)."""
    if isinstance(dilation, int):
        dh = dw = dilation
    else:
        dh, dw = dilation
    if stride != 1:
        # TODO(synk): stride > 1 would need strided output extraction; not implemented.
        raise NotImplementedError("pad_conv2d kernel supports stride=1 only")

    N, C, H, W = x.shape
    OC, Cw, KH, KW = weight.shape
    assert Cw == C, "groups != 1 not supported"  # TODO(synk): grouped conv

    ph = (KH // 2) * dh
    pw = (KW // 2) * dw
    Hp, Wp = H + 2 * ph, W + 2 * pw
    Ho = Hp - (KH - 1) * dh          # == H for odd kernels
    Wo = Wp - (KW - 1) * dw          # == W for odd kernels

    # Padded / lane-aligned sizes.
    Cp = _round_up(C, 8)
    OCp = _round_up(OC, 8)
    L = _round_up(Ho * Wp, 128)                       # lane-dense output length
    max_tap = (KH - 1) * dh * Wp + (KW - 1) * dw      # largest tap offset
    Lin = max_tap + L                                 # flat input length needed

    # Zero-pad channels + spatial, flatten spatial, pad flat tail so every tap
    # slice [start, start+L) stays in bounds.
    x_p = jnp.pad(x, ((0, 0), (0, Cp - C), (ph, ph), (pw, pw)))
    x_flat = jnp.pad(x_p.reshape(N, Cp, Hp * Wp),
                     ((0, 0), (0, 0), (0, Lin - Hp * Wp)))

    # Weights: (OC, C, KH, KW) -> (KH*KW, OCp, Cp), tap-major, lhs-ready.
    w_p = jnp.pad(weight, ((0, OCp - OC), (0, Cp - C), (0, 0), (0, 0)))
    w_taps = jnp.transpose(w_p, (2, 3, 0, 1)).reshape(KH * KW, OCp, Cp)

    if bias is None:
        bias = jnp.zeros((OC,), x.dtype)
    b_col = jnp.pad(bias, (0, OCp - OC)).reshape(OCp, 1)

    # Static per-tap start offsets into the flattened padded image.
    tap_starts = tuple(kh * dh * Wp + kw * dw
                       for kh in range(KH) for kw in range(KW))

    kern = functools.partial(_pad_conv2d_kernel, tap_starts=tap_starts, L=L)

    out_flat = pl.pallas_call(
        kern,
        out_shape=jax.ShapeDtypeStruct((N, OCp, L), x.dtype),
        grid_spec=pltpu.PrefetchScalarGridSpec(
            num_scalar_prefetch=0,
            grid=(N,),
            in_specs=[
                pl.BlockSpec((1, Cp, Lin), lambda n: (n, 0, 0)),
                # constant index_map -> weight/bias stay resident across grid steps
                pl.BlockSpec((KH * KW, OCp, Cp), lambda n: (0, 0, 0)),
                pl.BlockSpec((OCp, 1), lambda n: (0, 0)),
            ],
            out_specs=pl.BlockSpec((1, OCp, L), lambda n: (n, 0, 0)),
            scratch_shapes=[pltpu.VMEM((OCp, L), jnp.float32)],
        ),
        compiler_params=pltpu.CompilerParams(dimension_semantics=("parallel",)),
    )(x_flat, w_taps, b_col)

    # Strip padded out-channels, bleed columns, and flat padding -> NCHW.
    out = out_flat[:, :OC, :Ho * Wp].reshape(N, OC, Ho, Wp)[:, :, :, :Wo]
    return out


if __name__ == "__main__":
    key = jax.random.PRNGKey(0)
    k1, k2, k3 = jax.random.split(key, 3)

    # PadConv2d(in_channels=4, out_channels=8, kernel_size=3) on x: (2, 4, 16, 16)
    N, C, H, W = 2, 4, 16, 16
    OC, K = 8, 3

    x = jax.random.normal(k1, (N, C, H, W), jnp.float32)

    # deterministic parameter init (stand-in for PyTorch's kaiming-uniform init)
    fan_in = C * K * K
    bound = 1.0 / (fan_in ** 0.5)
    weight = jax.random.uniform(k2, (OC, C, K, K), jnp.float32, -bound, bound)
    bias = jax.random.uniform(k3, (OC,), jnp.float32, -bound, bound)

    out = pad_conv2d(x, weight, bias, stride=1, dilation=1)
    out = jax.block_until_ready(out)

    # reference: conv with explicit symmetric padding (== pad-then-conv)
    ref = jax.lax.conv_general_dilated(
        x, weight,
        window_strides=(1, 1),
        padding=((K // 2, K // 2), (K // 2, K // 2)),
        rhs_dilation=(1, 1),
        dimension_numbers=("NCHW", "OIHW", "NCHW"),
        precision=jax.lax.Precision.HIGHEST,
    ) + bias[None, :, None, None]

    assert out.shape == ref.shape == (N, OC, H, W), (out.shape, ref.shape)
    assert jnp.allclose(out, ref, atol=1e-3, rtol=1e-3), "mismatch vs reference conv"
    print("KERNEL_OK")
</pallas_src>

<mosaic_0001>
module attributes {stable_mosaic.version = 11 : i64} {
  func.func @_pad_conv2d_kernel(%arg0: i32, %arg1: memref<1x8x422xf32, #tpu.memory_space<vmem>>, %arg2: memref<9x8x8xf32, #tpu.memory_space<vmem>>, %arg3: memref<8x1xf32, #tpu.memory_space<vmem>>, %arg4: memref<1x8x384xf32, #tpu.memory_space<vmem>>, %arg5: memref<8x384xf32, #tpu.memory_space<vmem>>) attributes {dimension_semantics = [#tpu.dimension_semantics<parallel>], iteration_bounds = array<i64: 2>, scalar_prefetch = 0 : i64, scratch_operands = 1 : i64, tpu.core_type = #tpu.core_type<tc>, window_params = [{transform_indices = @transform_0, window_bounds = array<i64: 1, 8, 422>}, {pipeline_mode = #tpu.pipeline_mode<synchronous>, transform_indices = @transform_1, window_bounds = array<i64: 9, 8, 8>}, {pipeline_mode = #tpu.pipeline_mode<synchronous>, transform_indices = @transform_2, window_bounds = array<i64: 8, 1>}, {transform_indices = @transform_3, window_bounds = array<i64: 1, 8, 384>}]} {
    %cst = arith.constant 0.000000e+00 : f32
    %0 = vector.broadcast %cst : f32 to vector<8x384xf32>
    %c0 = arith.constant 0 : index
    %c0_0 = arith.constant 0 : index
    %1 = vector.load %arg5[%c0, %c0_0] : memref<8x384xf32, #tpu.memory_space<vmem>>, vector<8x384xf32>
    tpu.vector_store %arg5[%c0, %c0_0], %0 {strides = array<i32>} : memref<8x384xf32, #tpu.memory_space<vmem>>, vector<8x384xf32>,
    %c0_1 = arith.constant 0 : index
    %c0_2 = arith.constant 0 : index
    %c0_3 = arith.constant 0 : index
    %2 = vector.load %arg1[%c0_1, %c0_2, %c0_3] : memref<1x8x422xf32, #tpu.memory_space<vmem>>, vector<1x8x384xf32>
    %3 = vector.shape_cast %2 : vector<1x8x384xf32> to vector<8x384xf32>
    %c0_4 = arith.constant 0 : index
    %c0_5 = arith.constant 0 : index
    %4 = vector.load %arg5[%c0_4, %c0_5] : memref<8x384xf32, #tpu.memory_space<vmem>>, vector<8x384xf32>
    %c0_6 = arith.constant 0 : index
    %c0_7 = arith.constant 0 : index
    %c0_8 = arith.constant 0 : index
    %5 = vector.load %arg2[%c0_6, %c0_7, %c0_8] : memref<9x8x8xf32, #tpu.memory_space<vmem>>, vector<1x8x8xf32>
    %6 = vector.shape_cast %5 : vector<1x8x8xf32> to vector<8x8xf32>
    %cst_9 = arith.constant dense<0.000000e+00> : vector<8x384xf32>
    %7 = tpu.matmul %6, %3, %cst_9 {dimension_numbers = #tpu.dot_dimension_numbers<[1], [0], [0], [1], [0, 0, 1, 1], [], []>} : vector<8x8xf32>, vector<8x384xf32>, vector<8x384xf32> -> vector<8x384xf32>
    %8 = arith.addf %4, %7 : vector<8x384xf32>
    %c0_10 = arith.constant 0 : index
    %c0_11 = arith.constant 0 : index
    %9 = vector.load %arg5[%c0_10, %c0_11] : memref<8x384xf32, #tpu.memory_space<vmem>>, vector<8x384xf32>
    tpu.vector_store %arg5[%c0_10, %c0_11], %8 {strides = array<i32>} : memref<8x384xf32, #tpu.memory_space<vmem>>, vector<8x384xf32>,
    %c0_12 = arith.constant 0 : index
    %c0_13 = arith.constant 0 : index
    %c1 = arith.constant 1 : index
    %10 = vector.load %arg1[%c0_12, %c0_13, %c1] : memref<1x8x422xf32, #tpu.memory_space<vmem>>, vector<1x8x384xf32>
    %11 = vector.shape_cast %10 : vector<1x8x384xf32> to vector<8x384xf32>
    %c0_14 = arith.constant 0 : index
    %c0_15 = arith.constant 0 : index
    %12 = vector.load %arg5[%c0_14, %c0_15] : memref<8x384xf32, #tpu.memory_space<vmem>>, vector<8x384xf32>
    %c1_16 = arith.constant 1 : index
    %c0_17 = arith.constant 0 : index
    %c0_18 = arith.constant 0 : index
    %13 = vector.load %arg2[%c1_16, %c0_17, %c0_18] : memref<9x8x8xf32, #tpu.memory_space<vmem>>, vector<1x8x8xf32>
    %14 = vector.shape_cast %13 : vector<1x8x8xf32> to vector<8x8xf32>
    %cst_19 = arith.constant dense<0.000000e+00> : vector<8x384xf32>
    %15 = tpu.matmul %14, %11, %cst_19 {dimension_numbers = #tpu.dot_dimension_numbers<[1], [0], [0], [1], [0, 0, 1, 1], [], []>} : vector<8x8xf32>, vector<8x384xf32>, vector<8x384xf32> -> vector<8x384xf32>
    %16 = arith.addf %12, %15 : vector<8x384xf32>
    %c0_20 = arith.constant 0 : index
    %c0_21 = arith.constant 0 : index
    %17 = vector.load %arg5[%c0_20, %c0_21] : memref<8x384xf32, #tpu.memory_space<vmem>>, vector<8x384xf32>
    tpu.vector_store %arg5[%c0_20, %c0_21], %16 {strides = array<i32>} : memref<8x384xf32, #tpu.memory_space<vmem>>, vector<8x384xf32>,
    %c0_22 = arith.constant 0 : index
    %c0_23 = arith.constant 0 : index
    %c2 = arith.constant 2 : index
    %18 = vector.load %arg1[%c0_22, %c0_23, %c2] : memref<1x8x422xf32, #tpu.memory_space<vmem>>, vector<1x8x384xf32>
    %19 = vector.shape_cast %18 : vector<1x8x384xf32> to vector<8x384xf32>
    %c0_24 = arith.constant 0 : index
    %c0_25 = arith.constant 0 : index
    %20 = vector.load %arg5[%c0_24, %c0_25] : memref<8x384xf32, #tpu.memory_space<vmem>>, vector<8x384xf32>
    %c2_26 = arith.constant 2 : index
    %c0_27 = arith.constant 0 : index
    %c0_28 = arith.constant 0 : index
    %21 = vector.load %arg2[%c2_26, %c0_27, %c0_28] : memref<9x8x8xf32, #tpu.memory_space<vmem>>, vector<1x8x8xf32>
    %22 = vector.shape_cast %21 : vector<1x8x8xf32> to vector<8x8xf32>
    %cst_29 = arith.constant dense<0.000000e+00> : vector<8x384xf32>
    %23 = tpu.matmul %22, %19, %cst_29 {dimension_numbers = #tpu.dot_dimension_numbers<[1], [0], [0], [1], [0, 0, 1, 1], [], []>} : vector<8x8xf32>, vector<8x384xf32>, vector<8x384xf32> -> vector<8x384xf32>
    %24 = arith.addf %20, %23 : vector<8x384xf32>
    %c0_30 = arith.constant 0 : index
    %c0_31 = arith.constant 0 : index
    %25 = vector.load %arg5[%c0_30, %c0_31] : memref<8x384xf32, #tpu.memory_space<vmem>>, vector<8x384xf32>
    tpu.vector_store %arg5[%c0_30, %c0_31], %24 {strides = array<i32>} : memref<8x384xf32, #tpu.memory_space<vmem>>, vector<8x384xf32>,
    %c0_32 = arith.constant 0 : index
    %c0_33 = arith.constant 0 : index
    %c18 = arith.constant 18 : index
    %26 = vector.load %arg1[%c0_32, %c0_33, %c18] : memref<1x8x422xf32, #tpu.memory_space<vmem>>, vector<1x8x384xf32>
    %27 = vector.shape_cast %26 : vector<1x8x384xf32> to vector<8x384xf32>
    %c0_34 = arith.constant 0 : index
    %c0_35 = arith.constant 0 : index
    %28 = vector.load %arg5[%c0_34, %c0_35] : memref<8x384xf32, #tpu.memory_space<vmem>>, vector<8x384xf32>
    %c3 = arith.constant 3 : index
    %c0_36 = arith.constant 0 : index
    %c0_37 = arith.constant 0 : index
    %29 = vector.load %arg2[%c3, %c0_36, %c0_37] : memref<9x8x8xf32, #tpu.memory_space<vmem>>, vector<1x8x8xf32>
    %30 = vector.shape_cast %29 : vector<1x8x8xf32> to vector<8x8xf32>
    %cst_38 = arith.constant dense<0.000000e+00> : vector<8x384xf32>
    %31 = tpu.matmul %30, %27, %cst_38 {dimension_numbers = #tpu.dot_dimension_numbers<[1], [0], [0], [1], [0, 0, 1, 1], [], []>} : vector<8x8xf32>, vector<8x384xf32>, vector<8x384xf32> -> vector<8x384xf32>
    %32 = arith.addf %28, %31 : vector<8x384xf32>
    %c0_39 = arith.constant 0 : index
    %c0_40 = arith.constant 0 : index
    %33 = vector.load %arg5[%c0_39, %c0_40] : memref<8x384xf32, #tpu.memory_space<vmem>>, vector<8x384xf32>
    tpu.vector_store %arg5[%c0_39, %c0_40], %32 {strides = array<i32>} : memref<8x384xf32, #tpu.memory_space<vmem>>, vector<8x384xf32>,
    %c0_41 = arith.constant 0 : index
    %c0_42 = arith.constant 0 : index
    %c19 = arith.constant 19 : index
    %34 = vector.load %arg1[%c0_41, %c0_42, %c19] : memref<1x8x422xf32, #tpu.memory_space<vmem>>, vector<1x8x384xf32>
    %35 = vector.shape_cast %34 : vector<1x8x384xf32> to vector<8x384xf32>
    %c0_43 = arith.constant 0 : index
    %c0_44 = arith.constant 0 : index
    %36 = vector.load %arg5[%c0_43, %c0_44] : memref<8x384xf32, #tpu.memory_space<vmem>>, vector<8x384xf32>
    %c4 = arith.constant 4 : index
    %c0_45 = arith.constant 0 : index
    %c0_46 = arith.constant 0 : index
    %37 = vector.load %arg2[%c4, %c0_45, %c0_46] : memref<9x8x8xf32, #tpu.memory_space<vmem>>, vector<1x8x8xf32>
    %38 = vector.shape_cast %37 : vector<1x8x8xf32> to vector<8x8xf32>
    %cst_47 = arith.constant dense<0.000000e+00> : vector<8x384xf32>
    %39 = tpu.matmul %38, %35, %cst_47 {dimension_numbers = #tpu.dot_dimension_numbers<[1], [0], [0], [1], [0, 0, 1, 1], [], []>} : vector<8x8xf32>, vector<8x384xf32>, vector<8x384xf32> -> vector<8x384xf32>
    %40 = arith.addf %36, %39 : vector<8x384xf32>
    %c0_48 = arith.constant 0 : index
    %c0_49 = arith.constant 0 : index
    %41 = vector.load %arg5[%c0_48, %c0_49] : memref<8x384xf32, #tpu.memory_space<vmem>>, vector<8x384xf32>
    tpu.vector_store %arg5[%c0_48, %c0_49], %40 {strides = array<i32>} : memref<8x384xf32, #tpu.memory_space<vmem>>, vector<8x384xf32>,
    %c0_50 = arith.constant 0 : index
    %c0_51 = arith.constant 0 : index
    %c20 = arith.constant 20 : index
    %42 = vector.load %arg1[%c0_50, %c0_51, %c20] : memref<1x8x422xf32, #tpu.memory_space<vmem>>, vector<1x8x384xf32>
    %43 = vector.shape_cast %42 : vector<1x8x384xf32> to vector<8x384xf32>
    %c0_52 = arith.constant 0 : index
    %c0_53 = arith.constant 0 : index
    %44 = vector.load %arg5[%c0_52, %c0_53] : memref<8x384xf32, #tpu.memory_space<vmem>>, vector<8x384xf32>
    %c5 = arith.constant 5 : index
    %c0_54 = arith.constant 0 : index
    %c0_55 = arith.constant 0 : index
    %45 = vector.load %arg2[%c5, %c0_54, %c0_55] : memref<9x8x8xf32, #tpu.memory_space<vmem>>, vector<1x8x8xf32>
    %46 = vector.shape_cast %45 : vector<1x8x8xf32> to vector<8x8xf32>
    %cst_56 = arith.constant dense<0.000000e+00> : vector<8x384xf32>
    %47 = tpu.matmul %46, %43, %cst_56 {dimension_numbers = #tpu.dot_dimension_numbers<[1], [0], [0], [1], [0, 0, 1, 1], [], []>} : vector<8x8xf32>, vector<8x384xf32>, vector<8x384xf32> -> vector<8x384xf32>
    %48 = arith.addf %44, %47 : vector<8x384xf32>
    %c0_57 = arith.constant 0 : index
    %c0_58 = arith.constant 0 : index
    %49 = vector.load %arg5[%c0_57, %c0_58] : memref<8x384xf32, #tpu.memory_space<vmem>>, vector<8x384xf32>
    tpu.vector_store %arg5[%c0_57, %c0_58], %48 {strides = array<i32>} : memref<8x384xf32, #tpu.memory_space<vmem>>, vector<8x384xf32>,
    %c0_59 = arith.constant 0 : index
    %c0_60 = arith.constant 0 : index
    %c36 = arith.constant 36 : index
    %50 = vector.load %arg1[%c0_59, %c0_60, %c36] : memref<1x8x422xf32, #tpu.memory_space<vmem>>, vector<1x8x384xf32>
    %51 = vector.shape_cast %50 : vector<1x8x384xf32> to vector<8x384xf32>
    %c0_61 = arith.constant 0 : index
    %c0_62 = arith.constant 0 : index
    %52 = vector.load %arg5[%c0_61, %c0_62] : memref<8x384xf32, #tpu.memory_space<vmem>>, vector<8x384xf32>
    %c6 = arith.constant 6 : index
    %c0_63 = arith.constant 0 : index
    %c0_64 = arith.constant 0 : index
    %53 = vector.load %arg2[%c6, %c0_63, %c0_64] : memref<9x8x8xf32, #tpu.memory_space<vmem>>, vector<1x8x8xf32>
    %54 = vector.shape_cast %53 : vector<1x8x8xf32> to vector<8x8xf32>
    %cst_65 = arith.constant dense<0.000000e+00> : vector<8x384xf32>
    %55 = tpu.matmul %54, %51, %cst_65 {dimension_numbers = #tpu.dot_dimension_numbers<[1], [0], [0], [1], [0, 0, 1, 1], [], []>} : vector<8x8xf32>, vector<8x384xf32>, vector<8x384xf32> -> vector<8x384xf32>
    %56 = arith.addf %52, %55 : vector<8x384xf32>
    %c0_66 = arith.constant 0 : index
    %c0_67 = arith.constant 0 : index
    %57 = vector.load %arg5[%c0_66, %c0_67] : memref<8x384xf32, #tpu.memory_space<vmem>>, vector<8x384xf32>
    tpu.vector_store %arg5[%c0_66, %c0_67], %56 {strides = array<i32>} : memref<8x384xf32, #tpu.memory_space<vmem>>, vector<8x384xf32>,
    %c0_68 = arith.constant 0 : index
    %c0_69 = arith.constant 0 : index
    %c37 = arith.constant 37 : index
    %58 = vector.load %arg1[%c0_68, %c0_69, %c37] : memref<1x8x422xf32, #tpu.memory_space<vmem>>, vector<1x8x384xf32>
    %59 = vector.shape_cast %58 : vector<1x8x384xf32> to vector<8x384xf32>
    %c0_70 = arith.constant 0 : index
    %c0_71 = arith.constant 0 : index
    %60 = vector.load %arg5[%c0_70, %c0_71] : memref<8x384xf32, #tpu.memory_space<vmem>>, vector<8x384xf32>
    %c7 = arith.constant 7 : index
    %c0_72 = arith.constant 0 : index
    %c0_73 = arith.constant 0 : index
    %61 = vector.load %arg2[%c7, %c0_72, %c0_73] : memref<9x8x8xf32, #tpu.memory_space<vmem>>, vector<1x8x8xf32>
    %62 = vector.shape_cast %61 : vector<1x8x8xf32> to vector<8x8xf32>
    %cst_74 = arith.constant dense<0.000000e+00> : vector<8x384xf32>
    %63 = tpu.matmul %62, %59, %cst_74 {dimension_numbers = #tpu.dot_dimension_numbers<[1], [0], [0], [1], [0, 0, 1, 1], [], []>} : vector<8x8xf32>, vector<8x384xf32>, vector<8x384xf32> -> vector<8x384xf32>
    %64 = arith.addf %60, %63 : vector<8x384xf32>
    %c0_75 = arith.constant 0 : index
    %c0_76 = arith.constant 0 : index
    %65 = vector.load %arg5[%c0_75, %c0_76] : memref<8x384xf32, #tpu.memory_space<vmem>>, vector<8x384xf32>
    tpu.vector_store %arg5[%c0_75, %c0_76], %64 {strides = array<i32>} : memref<8x384xf32, #tpu.memory_space<vmem>>, vector<8x384xf32>,
    %c0_77 = arith.constant 0 : index
    %c0_78 = arith.constant 0 : index
    %c38 = arith.constant 38 : index
    %66 = vector.load %arg1[%c0_77, %c0_78, %c38] : memref<1x8x422xf32, #tpu.memory_space<vmem>>, vector<1x8x384xf32>
    %67 = vector.shape_cast %66 : vector<1x8x384xf32> to vector<8x384xf32>
    %c0_79 = arith.constant 0 : index
    %c0_80 = arith.constant 0 : index
    %68 = vector.load %arg5[%c0_79, %c0_80] : memref<8x384xf32, #tpu.memory_space<vmem>>, vector<8x384xf32>
    %c8 = arith.constant 8 : index
    %c0_81 = arith.constant 0 : index
    %c0_82 = arith.constant 0 : index
    %69 = vector.load %arg2[%c8, %c0_81, %c0_82] : memref<9x8x8xf32, #tpu.memory_space<vmem>>, vector<1x8x8xf32>
    %70 = vector.shape_cast %69 : vector<1x8x8xf32> to vector<8x8xf32>
    %cst_83 = arith.constant dense<0.000000e+00> : vector<8x384xf32>
    %71 = tpu.matmul %70, %67, %cst_83 {dimension_numbers = #tpu.dot_dimension_numbers<[1], [0], [0], [1], [0, 0, 1, 1], [], []>} : vector<8x8xf32>, vector<8x384xf32>, vector<8x384xf32> -> vector<8x384xf32>
    %72 = arith.addf %68, %71 : vector<8x384xf32>
    %c0_84 = arith.constant 0 : index
    %c0_85 = arith.constant 0 : index
    %73 = vector.load %arg5[%c0_84, %c0_85] : memref<8x384xf32, #tpu.memory_space<vmem>>, vector<8x384xf32>
    tpu.vector_store %arg5[%c0_84, %c0_85], %72 {strides = array<i32>} : memref<8x384xf32, #tpu.memory_space<vmem>>, vector<8x384xf32>,
    %c0_86 = arith.constant 0 : index
    %c0_87 = arith.constant 0 : index
    %74 = vector.load %arg5[%c0_86, %c0_87] : memref<8x384xf32, #tpu.memory_space<vmem>>, vector<8x384xf32>
    %c0_88 = arith.constant 0 : index
    %c0_89 = arith.constant 0 : index
    %75 = vector.load %arg3[%c0_88, %c0_89] : memref<8x1xf32, #tpu.memory_space<vmem>>, vector<8x1xf32>
    %76 = vector.broadcast %75 : vector<8x1xf32> to vector<8x384xf32>
    %77 = arith.addf %74, %76 : vector<8x384xf32>
    %c0_90 = arith.constant 0 : index
    %c0_91 = arith.constant 0 : index
    %c0_92 = arith.constant 0 : index
    %78 = vector.load %arg4[%c0_90, %c0_91, %c0_92] : memref<1x8x384xf32, #tpu.memory_space<vmem>>, vector<1x8x384xf32>
    %79 = vector.shape_cast %78 : vector<1x8x384xf32> to vector<8x384xf32>
    %80 = vector.shape_cast %77 : vector<8x384xf32> to vector<1x8x384xf32>
    tpu.vector_store %arg4[%c0_90, %c0_91, %c0_92], %80 {strides = array<i32>} : memref<1x8x384xf32, #tpu.memory_space<vmem>>, vector<1x8x384xf32>,
    return
  }
  func.func @transform_0(%arg0: i32) -> (i32, i32, i32) {
    %c0_i32 = arith.constant 0 : i32
    %c0_i32_0 = arith.constant 0 : i32
    %c0_i32_1 = arith.constant 0 : i32
    return %arg0, %c0_i32, %c0_i32_0 : i32, i32, i32
  }
  func.func @transform_1(%arg0: i32) -> (i32, i32, i32) {
    %c0_i32 = arith.constant 0 : i32
    %c0_i32_0 = arith.constant 0 : i32
    %c0_i32_1 = arith.constant 0 : i32
    %c0_i32_2 = arith.constant 0 : i32
    return %c0_i32, %c0_i32_0, %c0_i32_1 : i32, i32, i32
  }
  func.func @transform_2(%arg0: i32) -> (i32, i32) {
    %c0_i32 = arith.constant 0 : i32
    %c0_i32_0 = arith.constant 0 : i32
    %c0_i32_1 = arith.constant 0 : i32
    return %c0_i32, %c0_i32_0 : i32, i32
  }
  func.func @transform_3(%arg0: i32) -> (i32, i32, i32) {
    %c0_i32 = arith.constant 0 : i32
    %c0_i32_0 = arith.constant 0 : i32
    %c0_i32_1 = arith.constant 0 : i32
    return %arg0, %c0_i32, %c0_i32_0 : i32, i32, i32
  }
}

</mosaic_0001>

<bundles_post_ra>
// kernel: tpu_custom_call.1
= control target key start
LH: loop header
LB: loop body
LE: loop exit
PB: predicated region body
PF: predicated region fallthrough
CT: control target
= control target key end

     0   :  { %8 = vsyncpa [#allocation4], 0  ;;  %s2322_s0 = inlined_call_operand.vmem [shape: f32[2,8,422], index: 0, kind: input, shape index: {}]   ;;  %s2323_s1 = inlined_call_operand.vmem [shape: f32[9,8,8], index: 1, kind: input, shape index: {}]   ;;  %s2324_s2 = inlined_call_operand.vmem [shape: f32[8,1], index: 2, kind: input, shape index: {}]   ;;  %s2325_s3 = inlined_call_operand.hbm [shape: f32[2,8,384], index: 3, kind: output, shape index: {}]  }
   0x1   :  { %10 = vsyncpa [#allocation4 + $0x1], 0  ;;  %s2107_s12 = smov 0   ;;  %s2109_s13 = smov 0  }
   0x2   :  { %s2111_s14 = smov 0   ;;  %s2113_s15 = smov 0  }
   0x3 LB: > { %s2128_s16 = sadd.s32 4294967295, %s2073_s15   ;;  %s1843_s17 = sadd.s32 4294967294, %s2073_s15   ;;  %s2073_s15 = sphi %s2113_s15, %s2331_s15   ;;  %s2069_s14 = sphi %s2111_s14, %s2330_s14   ;;  %s2065_s13 = sphi %s2109_s13, %s2329_s13   ;;  %s2061_s12 = sphi %s2107_s12, %s2328_s12  }
   0x4   : > { %s2132_s18 = sadd.s32 1, %s2073_s15   ;;  %s91_s19 = sadd.s32 1, %s2069_s14 }
   0x5   : > { %s88_s20 = ssub.s32 %s2073_s15, %s2132_s18  ;;  %p101_p0 = scmp.ne.s32.totalorder %s2069_s14, %s2065_s13 }
   0x6   : > { %p89_p1 = scmp.eq.s32.totalorder %s88_s20, 0  ;;  %p102_p2 = scmp.eq.s32.totalorder %s2128_s16, 1 }
   0x7   : > { %p107_p3 = scmp.ne.s32.totalorder %s2065_s13, %s2061_s12  ;;  %p108_p4 = scmp.eq.s32.totalorder %s1843_s17, 1 }
   0x8   : > { %s2143_s21 = scalar_select %p89_p1, %s2069_s14, %s91_s19  }
   0x9   : > { %p2145_p5 = por %p102_p2, %p101_p0  ;;  %p2149_p6 = por %p108_p4, %p107_p3 }
   0xa   : > { %p1846_p7 = scmp.ge.s32.totalorder %s2073_s15, 1  ;;  %p140_p8 = scmp.lt.s32.totalorder %s2073_s15, 3 }
   0xc   : > { %p141_p9 = pnand %p1846_p7, %p140_p8 }
   0xd   : > { %p164_p10 = scmp.lt.s32.totalorder (!%p141_p9), %s2128_s16, 1  ;;  %v2075_v0 = vmov (!%p141_p9), 0.0   ;;  %s2076_s29 = smov (!%p141_p9), 127   ;;  %v178_v4 = vld [vmem:[%s2323_s1] sm:$0xff] (!%p141_p9)  ;;  %vm179_vm0 = vcmask (!%p141_p9), 64512   ;;  %vm2078_vm1 = vmmov (!%p141_p9), 0  }
   0xe   : > { %144 = sbr.rel (%p141_p9) target bundleno = 433 (0x1b1), region = 32  ;;  %247 = vmatprep.mubr.f32.mxu0 (!%p141_p9), %v2075_v0  ;;  %1897 = vmatprep.subr.mxu1 (!%p141_p9), %v2075_v0  ;;  %s2077_s5 = smov (!%p141_p9), 126   ;;  %v2084_v6 = vmov (!%p141_p9), 0   ;;  %v1757_v7 = vld [vmem:[%s2324_s2] sm:$0xff] (!%p141_p9)  ;;  %vm351_vm2 = vcmask (!%p141_p9), 1039360   ;;  %v1851_v13 = vld [vmem:[%s2323_s1 + $0x8] sm:$0xff] (!%p141_p9) }
   0xf   : > { %1899 = vmatprep.mubr.msk.f32.mxu1 (!%p141_p9), %vm2078_vm1, %v2075_v0  ;;  %s2079_s6 = smov (!%p141_p9), 110   ;;  %s2080_s7 = smov (!%p141_p9), 109   ;;  %2010 = vset.pattern.permute.xlu0 (!%p141_p9), %v2084_v6  ;;  %vm529_vm3 = vcmask (!%p141_p9), 1031168   ;;  %vm707_vm4 = vcmask (!%p141_p9), 900096   ;;  %v1854_v22 = vld [vmem:[%s2323_s1 + $0x10] sm:$0xff] (!%p141_p9)  ;;  %vm885_vm5 = vcmask (!%p141_p9), 891904  }
  0x10   : > { %s2081_s8 = smov (!%p141_p9), 108   ;;  %s2082_s9 = smov (!%p141_p9), 92   ;;  %v1857_v29 = vld [vmem:[%s2323_s1 + $0x18] sm:$0xff] (!%p141_p9)  ;;  %vm1063_vm6 = vcmask (!%p141_p9), 883712   ;;  %v1860_v38 = vld [vmem:[%s2323_s1 + $0x20] sm:$0xff] (!%p141_p9)  ;;  %v1863_v46 = vld [vmem:[%s2323_s1 + $0x28] sm:$0xff] (!%p141_p9) }
  0x11   : > { %s2083_s10 = smov (!%p141_p9), 91   ;;  %s2085_s11 = smov (!%p141_p9), 90   ;;  %vm1241_vm7 = vcmask (!%p141_p9), 752640   ;;  %v1866_v54 = vld [vmem:[%s2323_s1 + $0x30] sm:$0xff] (!%p141_p9)  ;;  %vm1419_vm8 = vcmask (!%p141_p9), 744448   ;;  %v1869_v61 = vld [vmem:[%s2323_s1 + $0x38] sm:$0xff] (!%p141_p9) }
  0x12   : > { %vm1597_vm9 = vcmask (!%p141_p9), 736256   ;;  %v1872_v6 = vld [vmem:[%s2323_s1 + $0x40] sm:$0xff] (!%p141_p9)  ;;  %s161_s17 = sand.u32 (!%p141_p9), 1, %s2065_s13   ;;  %s1959_s20 = smul.u32 (!%p141_p9), 384, %s2128_s16 }
  0x13   : > { %s1958_s19 = smul.u32 (!%p141_p9), 24, %s161_s17  ;;  %s2086_s30 = smov (!%p141_p9), [#allocation3]  }
  0x14   : > { %s2015_s4 = sshll.u32 (!%p141_p9), %s2086_s30, 4  ;;  %s2016_s4 = int_to_ptr.vmem [resolvable:$false] %s2015_s4 }
  0x15   : > { %s165_s24 = scalar_select %p164_p10, %s2128_s16, 1 }
  0x16   : > { %s1770_s16 = scalar_lea.sflag [#allocation4], %s161_s17 }
  0x17   : > { %s1878_s25 = sshll.u32 %s165_s24, 5  ;;  %s163_s24 = scalar_lea.vmem [#allocation3], %s1958_s19 }
  0x18   : > { %s2162_s28 = scalar_lea.vmem %s2322_s0, %s1878_s25  ;;  %s1784_s25 = sshll.u32 %s163_s24, 4  ;;  %s2282_s25 = int_to_ptr.vmem [resolvable:$true] %s1784_s25 }
  0x19   : > { %v331_v1 = vld [vmem:[%s2162_s28 + $0x8] sm:$0xff]  ;;  %v330_v2 = vld [vmem:[%s2162_s28] sm:$0xff]  ;;  %v332_v3 = vld [vmem:[%s2162_s28 + $0x10] sm:$0xff]  ;;  %p2018_p0 = scmp.lt.s32.totalorder %s2282_s25, %s2016_s4 }
  0x1a   : > { %345 = vrot.lane.b32.xlu0 %v331_v1, %s2076_s29  ;;  %343 = vrot.lane.b32.xlu1 %v330_v2, %s2076_s29  ;;  %v333_v5 = vld [vmem:[%s2162_s28 + $0x18] sm:$0xff]  ;;  %s2280_s28 = scalar_lea.hbm %s2325_s3, %s1959_s20 }
  0x1b   : > { %183 = vmatprep.subr.mxu0 %v331_v1  ;;  %1898 = vmatpush3.msra.mxu1 %v332_v3 }
  0x1c   : > { %184 = vmatpush1.msra.mxu0 %v330_v2  ;;  %1902 = vmatprep.subr.mxu1 %v2075_v0 }
  0x1d   : > { %1849 = vmatmul.mubr.msk.f32.vlgmr.msra.gmra.mrb[0].mxu0 %vm179_vm0, %v178_v4  ;;  %1900 = vmatmul.mubr.msk.f32.vlgmr.msra.gmra.mrb[0].mxu1 %vm179_vm0, %v178_v4 }
  0x1e   : > { %347 = vrot.lane.b32.xlu0 %v332_v3, %s2076_s29  ;;  %523 = vrot.lane.b32.xlu1 %v331_v1, %s2077_s5 }
  0x1f   : > { %425 = vmatprep.mubr.f32.mxu0 %v2075_v0  ;;  %1904 = vmatprep.mubr.msk.f32.mxu1 %vm2078_vm1, %v2075_v0 }
  0x22   : > { %525 = vrot.lane.b32.xlu0 %v332_v3, %s2077_s5  ;;  %521 = vrot.lane.b32.xlu1 %v330_v2, %s2077_s5 }
  0x26   : > { %701 = vrot.lane.b32.xlu0 %v331_v1, %s2079_s6  ;;  %703 = vrot.lane.b32.xlu1 %v332_v3, %s2079_s6 }
  0x2a   : > { %699 = vrot.lane.b32.xlu0 %v330_v2, %s2079_s6  ;;  %879 = vrot.lane.b32.xlu1 %v331_v1, %s2080_s7 }
  0x2e   : > { %881 = vrot.lane.b32.xlu0 %v332_v3, %s2080_s7  ;;  %877 = vrot.lane.b32.xlu1 %v330_v2, %s2080_s7 }
  0x32   : > { %349 = vrot.lane.b32.xlu0 %v333_v5, %s2076_s29  ;;  %527 = vrot.lane.b32.xlu1 %v333_v5, %s2077_s5  ;;  %s2011_s29 = scalar_lea.vmem %s2282_s25, 384  ;;  %s2017_s5 = scalar_lea.vmem %s2016_s4, 768 }
  0x33   : > { %p2012_p11 = scmp.ne.s32.totalorder %s2282_s25, %s2011_s29  ;;  %p2019_p1 = scmp.lt.s32.totalorder %s2017_s5, %s2011_s29 }
  0x35   : > { %p2013_p12 = pnand %p2012_p11, %p2145_p5  ;;  %p2020_p2 = por %p2019_p1, %p2018_p0 }
  0x36   : > { %1057 = vrot.lane.b32.xlu0 %v331_v1, %s2081_s8  ;;  %1059 = vrot.lane.b32.xlu1 %v332_v3, %s2081_s8 }
  0x37   : > { %p2014_p13 = pneg %p2013_p12 }
  0x39   : > { %p2021_p3 = pnand %p2020_p2, %p2014_p13 }
  0x3a   : > { %1055 = vrot.lane.b32.xlu0 %v330_v2, %s2081_s8  ;;  %705 = vrot.lane.b32.xlu1 %v333_v5, %s2079_s6 }
  0x3e   : > { %883 = vrot.lane.b32.xlu0 %v333_v5, %s2080_s7  ;;  %1235 = vrot.lane.b32.xlu1 %v331_v1, %s2082_s9 }
  0x42   : > { %1237 = vrot.lane.b32.xlu0 %v332_v3, %s2082_s9  ;;  %1233 = vrot.lane.b32.xlu1 %v330_v2, %s2082_s9 }
  0x46   : > { %1061 = vrot.lane.b32.xlu0 %v333_v5, %s2081_s8  ;;  %1239 = vrot.lane.b32.xlu1 %v333_v5, %s2082_s9 }
  0x4a   : > { %1413 = vrot.lane.b32.xlu0 %v331_v1, %s2083_s10  ;;  %1415 = vrot.lane.b32.xlu1 %v332_v3, %s2083_s10 }
  0x4e   : > { %1411 = vrot.lane.b32.xlu0 %v330_v2, %s2083_s10  ;;  %1417 = vrot.lane.b32.xlu1 %v333_v5, %s2083_s10 }
  0x52   : > { %1591 = vrot.lane.b32.xlu0 %v331_v1, %s2085_s11  ;;  %1593 = vrot.lane.b32.xlu1 %v332_v3, %s2085_s11 }
  0x56   : > { %1595 = vrot.lane.b32.xlu0 %v333_v5, %s2085_s11  ;;  %1589 = vrot.lane.b32.xlu1 %v330_v2, %s2085_s11 }
  0x5a   : > { %1760 = vperm.xlu0 %2010, %v1757_v7  }
  0x8c   : > { %v346_v8 = vpop.permute.xlu0 %345  ;;  %v344_v9 = vpop.permute.xlu1 %343 }
  0x8d   : > { %v352_v14 = vsel %vm351_vm2, %v344_v9, %v346_v8 }
  0x90   : > { %v348_v10 = vpop.permute.xlu0 %347  ;;  %v524_v11 = vpop.permute.xlu1 %523 }
  0x91   : > { %v353_v12 = vsel %vm351_vm2, %v346_v8, %v348_v10 }
  0x92   : > { %361 = vmatprep.subr.mxu0 %v353_v12 }
  0x93   : > { %362 = vmatpush1.msra.mxu0 %v352_v14 }
  0x94   : > { %v526_v15 = vpop.permute.xlu0 %525  ;;  %v522_v16 = vpop.permute.xlu1 %521  ;;  %1852 = vmatmul.mubr.msk.f32.vlgmr.msra.gmra.mrb[0].mxu0 %vm179_vm0, %v1851_v13 }
  0x95   : > { %v530_v17 = vsel %vm529_vm3, %v522_v16, %v524_v11  ;;  %v531_v18 = vsel %vm529_vm3, %v524_v11, %v526_v15  ;;  %603 = vmatprep.mubr.f32.mxu0 %v2075_v0 }
  0x96   : > { %539 = vmatprep.subr.mxu0 %v531_v18 }
  0x97   : > { %540 = vmatpush1.msra.mxu0 %v530_v17 }
  0x98   : > { %v702_v19 = vpop.permute.xlu0 %701  ;;  %v704_v20 = vpop.permute.xlu1 %703 }
  0x99   : > { %v709_v21 = vsel %vm707_vm4, %v702_v19, %v704_v20 }
  0x9a   : > { %717 = vmatprep.subr.mxu0 %v709_v21 }
  0x9c   : > { %v700_v23 = vpop.permute.xlu0 %699  ;;  %v880_v24 = vpop.permute.xlu1 %879  ;;  %1855 = vmatmul.mubr.msk.f32.vlgmr.msra.gmra.mrb[0].mxu0 %vm179_vm0, %v1854_v22 }
  0x9d   : > { %v708_v25 = vsel %vm707_vm4, %v700_v23, %v702_v19  ;;  %781 = vmatprep.mubr.f32.mxu0 %v2075_v0 }
  0x9e   : > { %718 = vmatpush1.msra.mxu0 %v708_v25 }
  0xa0   : > { %v882_v26 = vpop.permute.xlu0 %881  ;;  %v878_v27 = vpop.permute.xlu1 %877 }
  0xa1   : > { %v887_v28 = vsel %vm885_vm5, %v880_v24, %v882_v26  ;;  %v886_v30 = vsel %vm885_vm5, %v878_v27, %v880_v24 }
  0xa2   : > { %895 = vmatprep.subr.mxu0 %v887_v28 }
  0xa4   : > { %v350_v31 = vpop.permute.xlu0 %349  ;;  %v528_v32 = vpop.permute.xlu1 %527  ;;  %1858 = vmatmul.mubr.msk.f32.vlgmr.msra.gmra.mrb[0].mxu0 %vm179_vm0, %v1857_v29 }
  0xa5   : > { %v354_v33 = vsel %vm351_vm2, %v348_v10, %v350_v31  ;;  %896 = vmatpush1.msra.mxu0 %v886_v30  ;;  %959 = vmatprep.mubr.f32.mxu0 %v2075_v0  ;;  %v532_v34 = vsel %vm529_vm3, %v526_v15, %v528_v32 }
  0xa6   : > { %1903 = vmatpush3.msra.mxu1 %v354_v33 }
  0xa7   : > { %1907 = vmatprep.subr.mxu1 %v2075_v0  ;;  %1905 = vmatmul.mubr.msk.f32.vlgmr.msra.gmra.mrb[2].mxu1 %vm179_vm0, %v1851_v13 }
  0xa8   : > { %v1058_v35 = vpop.permute.xlu0 %1057  ;;  %v1060_v36 = vpop.permute.xlu1 %1059  ;;  %1908 = vmatpush3.msra.mxu1 %v532_v34  ;;  %1909 = vmatprep.mubr.msk.f32.mxu1 %vm2078_vm1, %v2075_v0 }
  0xa9   : > { %v1065_v37 = vsel %vm1063_vm6, %v1058_v35, %v1060_v36  ;;  %1912 = vmatprep.subr.mxu1 %v2075_v0 }
  0xaa   : > { %1073 = vmatprep.subr.mxu0 %v1065_v37 }
  0xab   : > { %1910 = vmatmul.mubr.msk.f32.vlgmr.msra.gmra.mrb[4].mxu1 %vm179_vm0, %v1854_v22 }
  0xac   : > { %v1056_v39 = vpop.permute.xlu0 %1055  ;;  %v706_v40 = vpop.permute.xlu1 %705  ;;  %1861 = vmatmul.mubr.msk.f32.vlgmr.msra.gmra.mrb[0].mxu0 %vm179_vm0, %v1860_v38  ;;  %1914 = vmatprep.mubr.msk.f32.mxu1 %vm2078_vm1, %v2075_v0 }
  0xad   : > { %v1064_v41 = vsel %vm1063_vm6, %v1056_v39, %v1058_v35  ;;  %v710_v42 = vsel %vm707_vm4, %v704_v20, %v706_v40  ;;  %1137 = vmatprep.mubr.f32.mxu0 %v2075_v0 }
  0xae   : > { %1913 = vmatpush3.msra.mxu1 %v710_v42  ;;  %1074 = vmatpush1.msra.mxu0 %v1064_v41 }
  0xaf   : > { %1917 = vmatprep.subr.mxu1 %v2075_v0  ;;  %1915 = vmatmul.mubr.msk.f32.vlgmr.msra.gmra.mrb[6].mxu1 %vm179_vm0, %v1857_v29 }
  0xb0   : > { %v884_v43 = vpop.permute.xlu0 %883  ;;  %v1236_v44 = vpop.permute.xlu1 %1235  ;;  %1919 = vmatprep.mubr.msk.f32.mxu1 %vm2078_vm1, %v2075_v0 }
  0xb1   : > { %v888_v45 = vsel %vm885_vm5, %v882_v26, %v884_v43 }
  0xb2   : > { %1918 = vmatpush3.msra.mxu1 %v888_v45 }
  0xb3   : > { %1920 = vmatmul.mubr.msk.f32.vlgmr.msra.gmra.mrb[8].mxu1 %vm179_vm0, %v1860_v38  ;;  %1922 = vmatprep.subr.mxu1 %v2075_v0 }
  0xb4   : > { %v1238_v47 = vpop.permute.xlu0 %1237  ;;  %v1234_v48 = vpop.permute.xlu1 %1233  ;;  %1864 = vmatmul.mubr.msk.f32.vlgmr.msra.gmra.mrb[0].mxu0 %vm179_vm0, %v1863_v46  ;;  %1924 = vmatprep.mubr.msk.f32.mxu1 %vm2078_vm1, %v2075_v0 }
  0xb5   : > { %v1242_v49 = vsel %vm1241_vm7, %v1234_v48, %v1236_v44  ;;  %v1243_v50 = vsel %vm1241_vm7, %v1236_v44, %v1238_v47  ;;  %1315 = vmatprep.mubr.f32.mxu0 %v2075_v0 }
  0xb6   : > { %1251 = vmatprep.subr.mxu0 %v1243_v50 }
  0xb7   : > { %1252 = vmatpush1.msra.mxu0 %v1242_v49 }
  0xb8   : > { %v1062_v51 = vpop.permute.xlu0 %1061  ;;  %v1240_v52 = vpop.permute.xlu1 %1239 }
  0xb9   : > { %v1066_v53 = vsel %vm1063_vm6, %v1060_v36, %v1062_v51  ;;  %v1244_v55 = vsel %vm1241_vm7, %v1238_v47, %v1240_v52 }
  0xba   : > { %1923 = vmatpush3.msra.mxu1 %v1066_v53 }
  0xbb   : > { %1925 = vmatmul.mubr.msk.f32.vlgmr.msra.gmra.mrb[10].mxu1 %vm179_vm0, %v1863_v46  ;;  %1927 = vmatprep.subr.mxu1 %v2075_v0 }
  0xbc   : > { %v1414_v56 = vpop.permute.xlu0 %1413  ;;  %v1416_v57 = vpop.permute.xlu1 %1415  ;;  %1867 = vmatmul.mubr.msk.f32.vlgmr.msra.gmra.mrb[0].mxu0 %vm179_vm0, %v1866_v54  ;;  %1928 = vmatpush3.msra.mxu1 %v1244_v55 }
  0xbd   : > { %1929 = vmatprep.mubr.msk.f32.mxu1 %vm2078_vm1, %v2075_v0  ;;  %v1421_v58 = vsel %vm1419_vm8, %v1414_v56, %v1416_v57  ;;  %1932 = vmatprep.subr.mxu1 %v2075_v0 }
  0xbe   : > { %1429 = vmatprep.subr.mxu0 %v1421_v58  ;;  %1493 = vmatprep.mubr.f32.mxu0 %v2075_v0 }
  0xbf   : > { %1930 = vmatmul.mubr.msk.f32.vlgmr.msra.gmra.mrb[12].mxu1 %vm179_vm0, %v1866_v54 }
  0xc0   : > { %v1412_v59 = vpop.permute.xlu0 %1411  ;;  %v1418_v60 = vpop.permute.xlu1 %1417  ;;  %1934 = vmatprep.mubr.msk.f32.mxu1 %vm2078_vm1, %v2075_v0 }
  0xc1   : > { %v1420_v62 = vsel %vm1419_vm8, %v1412_v59, %v1414_v56  ;;  %v1422_v63 = vsel %vm1419_vm8, %v1416_v57, %v1418_v60 }
  0xc2   : > { %1430 = vmatpush1.msra.mxu0 %v1420_v62  ;;  %1933 = vmatpush3.msra.mxu1 %v1422_v63 }
  0xc3   : > { %1935 = vmatmul.mubr.msk.f32.vlgmr.msra.gmra.mrb[14].mxu1 %vm179_vm0, %v1869_v61  ;;  %1937 = vmatprep.subr.mxu1 %v2075_v0 }
  0xc4   : > { %v1592_v1 = vpop.permute.xlu0 %1591  ;;  %v1594_v2 = vpop.permute.xlu1 %1593  ;;  %1870 = vmatmul.mubr.msk.f32.vlgmr.msra.gmra.mrb[0].mxu0 %vm179_vm0, %v1869_v61  ;;  %1939 = vmatprep.mubr.msk.f32.mxu1 %vm2078_vm1, %v2075_v0 }
  0xc5   : > { %v1599_v3 = vsel %vm1597_vm9, %v1592_v1, %v1594_v2  ;;  %1671 = vmatprep.mubr.f32.mxu0 %v2075_v0 }
  0xc6   : > { %1607 = vmatprep.subr.mxu0 %v1599_v3 }
  0xc8   : > { %v1596_v4 = vpop.permute.xlu0 %1595  ;;  %v1590_v5 = vpop.permute.xlu1 %1589 }
  0xc9   : > { %v1600_v7 = vsel %vm1597_vm9, %v1594_v2, %v1596_v4  ;;  %v1598_v8 = vsel %vm1597_vm9, %v1590_v5, %v1592_v1 }
  0xca   : > { %1608 = vmatpush1.msra.mxu0 %v1598_v8  ;;  %1938 = vmatpush3.msra.mxu1 %v1600_v7 }
  0xcb   : > { %1940 = vmatmul.mubr.msk.f32.vlgmr.msra.gmra.mrb[16].mxu1 %vm179_vm0, %v1872_v6 }
  0xcc   : > { %1873 = vmatmul.mubr.msk.f32.vlgmr.msra.gmra.mrb[0].mxu0 %vm179_vm0, %v1872_v6 }
  0xd9   : > { %v1761_v31 = vpop.permute.xlu0 %1760 }
  0xf0   : > { %v320_v9 = vpop.f32.mrb[0].mxu1 }
  0xf1   : > { %v1901_v10 = vpop.f32.mrb[1].mxu1 }
 0x17a   : > { %v498_v11 = vpop.f32.mrb[2].mxu1 }
 0x17b   : > { %v504_v12 = vadd.f32 %v498_v11, %v320_v9  ;;  %v1906_v0 = vpop.f32.mrb[3].mxu1 }
 0x17e   : > { %v676_v13 = vpop.f32.mrb[4].mxu1 }
 0x17f   : > { %v682_v14 = vadd.f32 %v676_v13, %v504_v12  ;;  %v1911_v15 = vpop.f32.mrb[5].mxu1 }
 0x182   : > { %v854_v16 = vpop.f32.mrb[6].mxu1 }
 0x183   : > { %v860_v17 = vadd.f32 %v854_v16, %v682_v14  ;;  %v1916_v18 = vpop.f32.mrb[7].mxu1 }
 0x186   : > { %v1032_v19 = vpop.f32.mrb[8].mxu1 }
 0x187   : > { %v1038_v20 = vadd.f32 %v1032_v19, %v860_v17  ;;  %v1921_v21 = vpop.f32.mrb[9].mxu1 }
 0x18e   : > { %v1210_v22 = vpop.f32.mrb[10].mxu1 }
 0x18f   : > { %v1216_v23 = vadd.f32 %v1210_v22, %v1038_v20  ;;  %v1926_v24 = vpop.f32.mrb[11].mxu1 }
 0x192   : > { %v1388_v25 = vpop.f32.mrb[12].mxu1 }
 0x193   : > { %v1394_v26 = vadd.f32 %v1388_v25, %v1216_v23  ;;  %v1931_v27 = vpop.f32.mrb[13].mxu1 }
 0x196   : > { %v1566_v28 = vpop.f32.mrb[14].mxu1 }
 0x197   : > { %v1572_v29 = vadd.f32 %v1566_v28, %v1394_v26  ;;  %v1936_v30 = vpop.f32.mrb[15].mxu1 }
 0x19e   : > { %v1744_v32 = vpop.f32.mrb[16].mxu1 }
 0x19f   : > { %v1750_v33 = vadd.f32 %v1744_v32, %v1572_v29  ;;  %v1673_v34 = vpop.f32.mrb[0].mxu0  ;;  %v1941_v35 = vpop.f32.mrb[17].mxu1 }
 0x1a0   : > { %v1763_v36 = vadd.f32 %v1761_v31, %v1673_v34  ;;  %v1675_v37 = vpop.f32.mrb[1].mxu0 }
 0x1a1   : > { %v1765_v38 = vadd.f32 %v1761_v31, %v1750_v33  ;;  %v1764_v39 = vadd.f32 %v1761_v31, %v1675_v37 }
 0x1a2   : > { %1766 = vst [vmem:[%s163_s24] sm:$0xff] %v1763_v36 }
 0x1a3   : > { %1768 = vst [vmem:[%s163_s24 + $0x10] sm:$0xff] %v1765_v38  ;;  %1767 = vst [vmem:[%s163_s24 + $0x8] sm:$0xff] %v1764_v39 }
 0x1a4   : > { %2024 = shalt.err (!%p2021_p3)
}
 0x1a5   : > { %s2025_s6 = scalar_lea.hbm %s2280_s28, 384  ;;  %s2029_s9 = scalar_lea.hbm %s2325_s3, 768 }
 0x1a6   : > { %p2026_p4 = scmp.ne.s32.totalorder %s2280_s28, %s2025_s6  ;;  %p2030_p9 = scmp.lt.u32.totalorder %s2280_s28, %s2325_s3 }
 0x1a7   : > { %p2031_p10 = scmp.lt.u32.totalorder %s2029_s9, %s2025_s6  ;;  %p2033_p12 = scmp.lt.u32.totalorder %s2025_s6, %s2280_s28 }
 0x1a8   : > { %p2027_p7 = pnand %p2026_p4, %p2145_p5 }
 0x1a9   : > { %p2032_p11 = por %p2031_p10, %p2030_p9 }
 0x1aa   : > { %p2028_p8 = pneg %p2027_p7 }
 0x1ab   : > { %p2034_p13 = por %p2033_p12, %p2032_p11 }
 0x1ad   : > { %p2035_p0 = pnand %p2034_p13, %p2028_p8 }
 0x1af   : > { %2038 = shalt.err (!%p2035_p0)
}
 0x1b0   : > { %1960 = dma.vmem_to_hbm [thread:$0]  (%p2145_p5), %s2282_s25, 384, %s2280_s28, %s1770_s16  }
 0x1b1 PF: > { %p1966_p1 = scmp.ge.s32.totalorder %s2073_s15, 2  ;;  %s1796_s17 = sand.u32 1, %s2061_s12  }
 0x1b2   : > { %s1797_s19 = scalar_lea.sflag [#allocation4], %s1796_s17 }
 0x1b3   : > { %p1963_p2 = pnand %p1966_p1, %p2149_p6 }
 0x1b5   : > { %2056 = dma.done.wait (!%p1963_p2), %s1797_s19, 384  }
 0x1b6   : > { %2058 = vsyncadd (!%p1963_p2), %s1797_s19, 4294966912  ;;  %p13_p3 = scmp.ge.s32.totalorder %s2132_s18, 4   ;;  %s2328_s12 = smov %s2065_s13 }
 0x1b7   : > { %s2329_s13 = smov %s2069_s14  ;;  %s2330_s14 = smov %s2143_s21 }
 0x1b8   : > { %s2331_s15 = smov %s2132_s18  ;;  %15 = sbr.rel (!%p13_p3) target bundleno = 3 (0x3), region = 75 }
 0x1bf   :  { %1802 = vsyncpa [#allocation4], 1 }
 0x1c0   :  { %1804 = vsyncpa [#allocation4 + $0x1], 1 }

</bundles_post_ra>
